<compile_context>
chip_gen: v6e
topology: v6e:2x2x1
jax: 0.10.0
libtpu: 0.0.40
codegen_flags: <defaults>
</compile_context>

<pallas_src>
import jax
import jax.numpy as jnp
from jax.experimental import pallas as pl
from jax.experimental.pallas import tpu as pltpu

STATE_SIZE = 2
ACTION_SIZE = 3
HIDDEN = 64

SUBLANE = 8
H_PAD = 128   # hidden padded to a full 128-lane tile
O_PAD = 128   # output lanes padded for an unmasked, lane-dense store


def _round_up(n, m):
    return (n + m - 1) // m * m


def qnetwork_kernel(x_ref, w1_ref, b1_ref, w2_ref, b2_ref, w3_ref, b3_ref,
                    out_ref):
    x = x_ref[...]                                   # (TB, S)
    w1 = w1_ref[...]                                 # (S, Hp)

    # fc1 on the VPU: K = STATE_SIZE = 2 is far too small to pay MXU
    # push/pop latency; two broadcast FMAs use otherwise-idle VALU slots.
    h1 = b1_ref[...]                                 # (1, Hp), broadcasts up
    for s in range(x.shape[1]):                      # static unroll (S = 2)
        h1 = h1 + x[:, s:s + 1] * w1[s:s + 1, :]
    h1 = jnp.maximum(h1, 0.0)                        # (TB, Hp)

    # fc2 + ReLU on the MXU (128x128 full tile).
    h2 = jnp.dot(h1, w2_ref[...], preferred_element_type=jnp.float32)
    h2 = jnp.maximum(h2 + b2_ref[...], 0.0)          # (TB, Hp)

    # fc3; output lane-padded to 128 so the store is dense and unmasked.
    out = jnp.dot(h2, w3_ref[...], preferred_element_type=jnp.float32)
    out_ref[...] = (out + b3_ref[...]).astype(out_ref.dtype)   # (TB, Op)


def _pad_params(p):
    """Zero-pad params to lane-dense tiles: hidden 64->128, actions 3->128."""
    def pad2(a, rows, cols):
        return jnp.pad(a, ((0, rows - a.shape[0]), (0, cols - a.shape[1])))

    return dict(
        w1=pad2(p["w1"], STATE_SIZE, H_PAD), b1=pad2(p["b1"], 1, H_PAD),
        w2=pad2(p["w2"], H_PAD, H_PAD),      b2=pad2(p["b2"], 1, H_PAD),
        w3=pad2(p["w3"], H_PAD, O_PAD),      b3=pad2(p["b3"], 1, O_PAD),
    )


def qnetwork_forward(x, params, *, block_b=512):
    """x: (B, state_size) f32; params: dict of (in, out) weights, (1, out) biases."""
    B = x.shape[0]
    p = _pad_params(params)

    # Batch tile: multiple of 8 sublanes, capped by block_b; keeps per-step
    # VMEM (x tile + h1/h2 + double-buffered out tile) small even on v7x.
    TB = min(block_b, _round_up(B, SUBLANE))
    Bp = _round_up(B, TB)
    if Bp != B:
        x = jnp.pad(x, ((0, Bp - B), (0, 0)))

    const = lambda shape: pl.BlockSpec(shape, lambda i: (0, 0))  # resident

    out = pl.pallas_call(
        qnetwork_kernel,
        out_shape=jax.ShapeDtypeStruct((Bp, O_PAD), jnp.float32),
        grid=(Bp // TB,),
        in_specs=[
            pl.BlockSpec((TB, STATE_SIZE), lambda i: (i, 0)),
            const((STATE_SIZE, H_PAD)), const((1, H_PAD)),
            const((H_PAD, H_PAD)),      const((1, H_PAD)),
            const((H_PAD, O_PAD)),      const((1, O_PAD)),
        ],
        out_specs=pl.BlockSpec((TB, O_PAD), lambda i: (i, 0)),
        compiler_params=pltpu.CompilerParams(
            dimension_semantics=("parallel",),
        ),
    )(x, p["w1"], p["b1"], p["w2"], p["b2"], p["w3"], p["b3"])

    return out[:B, :ACTION_SIZE]


def init_params(key):
    """Deterministic init mimicking torch.nn.Linear default U[-1/sqrt(fan_in), +]."""
    def linear(key, fan_in, fan_out):
        kw, kb = jax.random.split(key)
        bound = 1.0 / jnp.sqrt(float(fan_in))
        w = jax.random.uniform(kw, (fan_in, fan_out), jnp.float32, -bound, bound)
        b = jax.random.uniform(kb, (1, fan_out), jnp.float32, -bound, bound)
        return w, b

    k1, k2, k3 = jax.random.split(key, 3)
    w1, b1 = linear(k1, STATE_SIZE, HIDDEN)
    w2, b2 = linear(k2, HIDDEN, HIDDEN)
    w3, b3 = linear(k3, HIDDEN, ACTION_SIZE)
    return {"w1": w1, "b1": b1, "w2": w2, "b2": b2, "w3": w3, "b3": b3}


def reference_forward(x, p):
    h1 = jnp.maximum(x @ p["w1"] + p["b1"], 0.0)
    h2 = jnp.maximum(h1 @ p["w2"] + p["b2"], 0.0)
    return h2 @ p["w3"] + p["b3"]


if __name__ == "__main__":
    key = jax.random.PRNGKey(0)
    kx, kp, kx2 = jax.random.split(key, 3)
    params = init_params(kp)

    # Small online-inference style batch (grid of 1).
    B = 8
    x = jax.random.normal(kx, (B, STATE_SIZE), jnp.float32)
    out = jax.block_until_ready(qnetwork_forward(x, params))
    ref = reference_forward(x, params)
    assert out.shape == (B, ACTION_SIZE)
    assert jnp.allclose(out, ref, atol=1e-5, rtol=1e-5)

    # Multi-tile batch: exercises the batch grid + batch padding path.
    B2 = 48
    x2 = jax.random.normal(kx2, (B2, STATE_SIZE), jnp.float32)
    out2 = jax.block_until_ready(qnetwork_forward(x2, params, block_b=16))
    ref2 = reference_forward(x2, params)
    assert out2.shape == (B2, ACTION_SIZE)
    assert jnp.allclose(out2, ref2, atol=1e-5, rtol=1e-5)

    print("KERNEL_OK")
</pallas_src>

<mosaic_0001>
module attributes {stable_mosaic.version = 11 : i64} {
  func.func @qnetwork_kernel(%arg0: i32, %arg1: memref<8x2xf32, #tpu.memory_space<vmem>>, %arg2: memref<2x128xf32, #tpu.memory_space<vmem>>, %arg3: memref<1x128xf32, #tpu.memory_space<vmem>>, %arg4: memref<128x128xf32, #tpu.memory_space<vmem>>, %arg5: memref<1x128xf32, #tpu.memory_space<vmem>>, %arg6: memref<128x128xf32, #tpu.memory_space<vmem>>, %arg7: memref<1x128xf32, #tpu.memory_space<vmem>>, %arg8: memref<8x128xf32, #tpu.memory_space<vmem>>) attributes {dimension_semantics = [#tpu.dimension_semantics<parallel>], iteration_bounds = array<i64: 1>, scalar_prefetch = 0 : i64, scratch_operands = 0 : i64, tpu.core_type = #tpu.core_type<tc>, window_params = [{transform_indices = @transform_0, window_bounds = array<i64: 8, 2>}, {pipeline_mode = #tpu.pipeline_mode<synchronous>, transform_indices = @transform_1, window_bounds = array<i64: 2, 128>}, {pipeline_mode = #tpu.pipeline_mode<synchronous>, transform_indices = @transform_2, window_bounds = array<i64: 1, 128>}, {pipeline_mode = #tpu.pipeline_mode<synchronous>, transform_indices = @transform_3, window_bounds = array<i64: 128, 128>}, {pipeline_mode = #tpu.pipeline_mode<synchronous>, transform_indices = @transform_4, window_bounds = array<i64: 1, 128>}, {pipeline_mode = #tpu.pipeline_mode<synchronous>, transform_indices = @transform_5, window_bounds = array<i64: 128, 128>}, {pipeline_mode = #tpu.pipeline_mode<synchronous>, transform_indices = @transform_6, window_bounds = array<i64: 1, 128>}, {transform_indices = @transform_7, window_bounds = array<i64: 8, 128>}]} {
    %c0 = arith.constant 0 : index
    %c0_0 = arith.constant 0 : index
    %0 = vector.load %arg1[%c0, %c0_0] : memref<8x2xf32, #tpu.memory_space<vmem>>, vector<8x2xf32>
    %c0_1 = arith.constant 0 : index
    %c0_2 = arith.constant 0 : index
    %1 = vector.load %arg2[%c0_1, %c0_2] : memref<2x128xf32, #tpu.memory_space<vmem>>, vector<2x128xf32>
    %c0_3 = arith.constant 0 : index
    %c0_4 = arith.constant 0 : index
    %2 = vector.load %arg3[%c0_3, %c0_4] : memref<1x128xf32, #tpu.memory_space<vmem>>, vector<1x128xf32>
    %3 = vector.extract_strided_slice %0 {offsets = [0, 0], sizes = [8, 1], strides = [1, 1]} : vector<8x2xf32> to vector<8x1xf32>
    %4 = vector.extract_strided_slice %1 {offsets = [0, 0], sizes = [1, 128], strides = [1, 1]} : vector<2x128xf32> to vector<1x128xf32>
    %5 = vector.broadcast %3 : vector<8x1xf32> to vector<8x128xf32>
    %6 = vector.broadcast %4 : vector<1x128xf32> to vector<8x128xf32>
    %7 = arith.mulf %5, %6 : vector<8x128xf32>
    %8 = vector.broadcast %2 : vector<1x128xf32> to vector<8x128xf32>
    %9 = arith.addf %8, %7 : vector<8x128xf32>
    %10 = vector.extract_strided_slice %0 {offsets = [0, 1], sizes = [8, 1], strides = [1, 1]} : vector<8x2xf32> to vector<8x1xf32>
    %11 = vector.extract_strided_slice %1 {offsets = [1, 0], sizes = [1, 128], strides = [1, 1]} : vector<2x128xf32> to vector<1x128xf32>
    %12 = vector.broadcast %10 : vector<8x1xf32> to vector<8x128xf32>
    %13 = vector.broadcast %11 : vector<1x128xf32> to vector<8x128xf32>
    %14 = arith.mulf %12, %13 : vector<8x128xf32>
    %15 = arith.addf %9, %14 : vector<8x128xf32>
    %cst = arith.constant 0.000000e+00 : f32
    %16 = vector.broadcast %cst : f32 to vector<8x128xf32>
    %17 = arith.maximumf %15, %16 : vector<8x128xf32>
    %c0_5 = arith.constant 0 : index
    %c0_6 = arith.constant 0 : index
    %18 = vector.load %arg4[%c0_5, %c0_6] : memref<128x128xf32, #tpu.memory_space<vmem>>, vector<128x128xf32>
    %cst_7 = arith.constant dense<0.000000e+00> : vector<8x128xf32>
    %19 = tpu.matmul %17, %18, %cst_7 {dimension_numbers = #tpu.dot_dimension_numbers<[1], [0], [0], [1], [0, 0, 1, 1], [], []>} : vector<8x128xf32>, vector<128x128xf32>, vector<8x128xf32> -> vector<8x128xf32>
    %c0_8 = arith.constant 0 : index
    %c0_9 = arith.constant 0 : index
    %20 = vector.load %arg5[%c0_8, %c0_9] : memref<1x128xf32, #tpu.memory_space<vmem>>, vector<1x128xf32>
    %21 = vector.broadcast %20 : vector<1x128xf32> to vector<8x128xf32>
    %22 = arith.addf %19, %21 : vector<8x128xf32>
    %cst_10 = arith.constant 0.000000e+00 : f32
    %23 = vector.broadcast %cst_10 : f32 to vector<8x128xf32>
    %24 = arith.maximumf %22, %23 : vector<8x128xf32>
    %c0_11 = arith.constant 0 : index
    %c0_12 = arith.constant 0 : index
    %25 = vector.load %arg6[%c0_11, %c0_12] : memref<128x128xf32, #tpu.memory_space<vmem>>, vector<128x128xf32>
    %cst_13 = arith.constant dense<0.000000e+00> : vector<8x128xf32>
    %26 = tpu.matmul %24, %25, %cst_13 {dimension_numbers = #tpu.dot_dimension_numbers<[1], [0], [0], [1], [0, 0, 1, 1], [], []>} : vector<8x128xf32>, vector<128x128xf32>, vector<8x128xf32> -> vector<8x128xf32>
    %c0_14 = arith.constant 0 : index
    %c0_15 = arith.constant 0 : index
    %27 = vector.load %arg7[%c0_14, %c0_15] : memref<1x128xf32, #tpu.memory_space<vmem>>, vector<1x128xf32>
    %28 = vector.broadcast %27 : vector<1x128xf32> to vector<8x128xf32>
    %29 = arith.addf %26, %28 : vector<8x128xf32>
    %c0_16 = arith.constant 0 : index
    %c0_17 = arith.constant 0 : index
    %30 = vector.load %arg8[%c0_16, %c0_17] : memref<8x128xf32, #tpu.memory_space<vmem>>, vector<8x128xf32>
    tpu.vector_store %arg8[%c0_16, %c0_17], %29 {strides = array<i32>} : memref<8x128xf32, #tpu.memory_space<vmem>>, vector<8x128xf32>,
    return
  }
  func.func @transform_0(%arg0: i32) -> (i32, i32) {
    %c0_i32 = arith.constant 0 : i32
    %c0_i32_0 = arith.constant 0 : i32
    return %arg0, %c0_i32 : i32, i32
  }
  func.func @transform_1(%arg0: i32) -> (i32, i32) {
    %c0_i32 = arith.constant 0 : i32
    %c0_i32_0 = arith.constant 0 : i32
    %c0_i32_1 = arith.constant 0 : i32
    return %c0_i32, %c0_i32_0 : i32, i32
  }
  func.func @transform_2(%arg0: i32) -> (i32, i32) {
    %c0_i32 = arith.constant 0 : i32
    %c0_i32_0 = arith.constant 0 : i32
    %c0_i32_1 = arith.constant 0 : i32
    return %c0_i32, %c0_i32_0 : i32, i32
  }
  func.func @transform_3(%arg0: i32) -> (i32, i32) {
    %c0_i32 = arith.constant 0 : i32
    %c0_i32_0 = arith.constant 0 : i32
    %c0_i32_1 = arith.constant 0 : i32
    return %c0_i32, %c0_i32_0 : i32, i32
  }
  func.func @transform_4(%arg0: i32) -> (i32, i32) {
    %c0_i32 = arith.constant 0 : i32
    %c0_i32_0 = arith.constant 0 : i32
    %c0_i32_1 = arith.constant 0 : i32
    return %c0_i32, %c0_i32_0 : i32, i32
  }
  func.func @transform_5(%arg0: i32) -> (i32, i32) {
    %c0_i32 = arith.constant 0 : i32
    %c0_i32_0 = arith.constant 0 : i32
    %c0_i32_1 = arith.constant 0 : i32
    return %c0_i32, %c0_i32_0 : i32, i32
  }
  func.func @transform_6(%arg0: i32) -> (i32, i32) {
    %c0_i32 = arith.constant 0 : i32
    %c0_i32_0 = arith.constant 0 : i32
    %c0_i32_1 = arith.constant 0 : i32
    return %c0_i32, %c0_i32_0 : i32, i32
  }
  func.func @transform_7(%arg0: i32) -> (i32, i32) {
    %c0_i32 = arith.constant 0 : i32
    %c0_i32_0 = arith.constant 0 : i32
    return %arg0, %c0_i32 : i32, i32
  }
}

</mosaic_0001>

<bundles_post_ra>
// kernel: tpu_custom_call.1
= control target key start
LH: loop header
LB: loop body
LE: loop exit
PB: predicated region body
PF: predicated region fallthrough
CT: control target
= control target key end

     0   :  { %12 = vsyncpa [#allocation3], 0  ;;  %s581_s0 = inlined_call_operand.vmem [shape: f32[8,2], index: 0, kind: input, shape index: {}]   ;;  %s582_s1 = inlined_call_operand.vmem [shape: f32[2,128], index: 1, kind: input, shape index: {}]   ;;  %s583_s2 = inlined_call_operand.vmem [shape: f32[1,128], index: 2, kind: input, shape index: {}]   ;;  %s584_s3 = inlined_call_operand.hbm [shape: f32[128,128], index: 3, kind: input, shape index: {}]   ;;  %s585_s4 = inlined_call_operand.vmem [shape: f32[1,128], index: 4, kind: input, shape index: {}]   ;;  %s586_s5 = inlined_call_operand.hbm [shape: f32[128,128], index: 5, kind: input, shape index: {}]   ;;  %s587_s6 = inlined_call_operand.vmem [shape: f32[1,128], index: 6, kind: input, shape index: {}]   ;;  %s588_s7 = inlined_call_operand.hbm [shape: f32[8,128], index: 7, kind: output, shape index: {}]  }
   0x1   :  { %13 = vsyncpa [#allocation6], 0 }
   0x2   :  { %14 = vsyncpa [#allocation4], 0  ;;  %s474_s24 = smov [#allocation2]  }
   0x3   :  { %s26_s25 = sshll.u32 %s474_s24, 4  ;;  %s27_s25 = int_to_ptr.vmem [resolvable:$true] %s26_s25 }
   0x4   :  { %s416_s26 = scalar_lea.vmem %s27_s25, 2048  ;;  %p421_p1 = scmp.lt.s32.totalorder %s27_s25, %s27_s25 }
   0x5   :  { %p417_p0 = scmp.ne.s32.totalorder %s27_s25, %s416_s26  ;;  %p422_p2 = scmp.lt.s32.totalorder %s416_s26, %s416_s26 }
   0x7   :  { %p423_p3 = por %p422_p2, %p421_p1 }
   0x9   :  { %p424_p4 = pnand %p423_p3, %p417_p0 }
   0xb   :  { %427 = shalt.err (!%p424_p4)
}
   0xc   :  { %s475_s27 = smov 128   ;;  %s476_s28 = smov 8  }
   0xd   :  { %32 = dma.hbm_to_vmem [thread:$0]  %s584_s3, 2048, %s27_s25, [#allocation3], %s475_s27, %s475_s27, %s476_s28  }
   0xe   :  { %s477_s8 = smov [#allocation5]  }
   0xf   :  { %s40_s9 = sshll.u32 %s477_s8, 4  ;;  %s41_s9 = int_to_ptr.vmem [resolvable:$true] %s40_s9 }
  0x10   :  { %s436_s10 = scalar_lea.vmem %s41_s9, 2048  ;;  %p441_p6 = scmp.lt.s32.totalorder %s41_s9, %s41_s9 }
  0x11   :  { %p437_p5 = scmp.ne.s32.totalorder %s41_s9, %s436_s10  ;;  %p442_p7 = scmp.lt.s32.totalorder %s436_s10, %s436_s10 }
  0x13   :  { %p443_p8 = por %p442_p7, %p441_p6 }
  0x15   :  { %p444_p9 = pnand %p443_p8, %p437_p5 }
  0x17   :  { %447 = shalt.err (!%p444_p9)
}
  0x18   :  { %46 = dma.hbm_to_vmem [thread:$0]  %s586_s5, 2048, %s41_s9, [#allocation6], %s475_s27, %s475_s27, %s476_s28  }
  0x19   :  { %468 = dma.done.wait [#allocation3], 2048  }
  0x1a   :  { %469 = vsyncadd [#allocation3], 4294965248 }
  0x1b   :  { %470 = dma.done.wait [#allocation6], 2048  }
  0x1c   :  { %471 = vsyncadd [#allocation6], 4294965248  ;;  %v478_v0 = vmov 0   ;;  %v479_v1 = vmov 0.0   ;;  %v55_v2 = vld [vmem:[%s581_s0] sm:$0xff]  ;;  %v101_v3 = vld [vmem:[#allocation2 + $0x78] sm:$0xff]  ;;  %v63_v33 = vlaneseq }
  0x1d   :  { %406 = vset.pattern.permute.xlu0 %v478_v0  ;;  %327 = vmatprep.subr.mxu0 %v479_v1  ;;  %v100_v4 = vld [vmem:[#allocation2 + $0x70] sm:$0xff]  ;;  %v99_v5 = vld [vmem:[#allocation2 + $0x68] sm:$0xff]  ;;  %v98_v6 = vld [vmem:[#allocation2 + $0x60] sm:$0xff]  ;;  %v480_v7 = vmov 1   ;;  %vm481_vm0 = vmmov 0   ;;  %s482_s18 = smov [#allocation7]  }
  0x1e   :  { %362 = vmatprep.subr.mxu1 %v479_v1  ;;  %60 = vperm.xlu0 %406, %v55_v2   ;;  %v97_v8 = vld [vmem:[#allocation2 + $0x58] sm:$0xff]  ;;  %v96_v9 = vld [vmem:[#allocation2 + $0x50] sm:$0xff]  ;;  %v95_v12 = vld [vmem:[#allocation2 + $0x48] sm:$0xff]  ;;  %v64_v34 = vshrl.u32 %v63_v33, 7  ;;  %s280_s19 = sshll.u32 %s482_s18, 4  ;;  %s281_s19 = int_to_ptr.vmem [resolvable:$true] %s280_s19 }
  0x1f   :  { %328 = vmatpush3.msra.mxu0 %v101_v3  ;;  %359 = vmatprep.mubr.msk.f32.mxu0 %vm481_vm0, %v479_v1  ;;  %v195_v10 = vld [vmem:[#allocation5 + $0x78] sm:$0xff]  ;;  %v194_v11 = vld [vmem:[#allocation5 + $0x70] sm:$0xff]  ;;  %v193_v13 = vld [vmem:[#allocation5 + $0x68] sm:$0xff]  ;;  %s448_s20 = scalar_lea.vmem %s281_s19, 128  ;;  %p453_p11 = scmp.lt.s32.totalorder %s281_s19, %s281_s19 }
  0x20   :  { %329 = vmatprep.subr.mxu0 %v479_v1  ;;  %394 = vmatprep.mubr.msk.f32.mxu1 %vm481_vm0, %v479_v1  ;;  %v94_v14 = vld [vmem:[#allocation2 + $0x40] sm:$0xff]  ;;  %v93_v16 = vld [vmem:[#allocation2 + $0x38] sm:$0xff]  ;;  %v92_v18 = vld [vmem:[#allocation2 + $0x30] sm:$0xff]  ;;  %v65_v35 = vsub.s32 0, %v64_v34  ;;  %v81_v38 = vsub.s32 1, %v64_v34  ;;  %p449_p10 = scmp.ne.s32.totalorder %s281_s19, %s448_s20  ;;  %p454_p12 = scmp.lt.s32.totalorder %s448_s20, %s448_s20 }
  0x21   :  { %330 = vmatpush3.msra.mxu0 %v100_v4  ;;  %363 = vmatpush3.msra.mxu1 %v195_v10  ;;  %v192_v15 = vld [vmem:[#allocation5 + $0x60] sm:$0xff]  ;;  %v191_v17 = vld [vmem:[#allocation5 + $0x58] sm:$0xff]  ;;  %v190_v19 = vld [vmem:[#allocation5 + $0x50] sm:$0xff] }
  0x22   :  { %331 = vmatprep.subr.mxu0 %v479_v1  ;;  %407 = vset.pattern.permute.xlu0 %v480_v7  ;;  %v91_v20 = vld [vmem:[#allocation2 + $0x28] sm:$0xff]  ;;  %v90_v22 = vld [vmem:[#allocation2 + $0x20] sm:$0xff]  ;;  %v89_v24 = vld [vmem:[#allocation2 + $0x18] sm:$0xff]  ;;  %p455_p13 = por %p454_p12, %p453_p11 }
  0x23   :  { %332 = vmatpush3.msra.mxu0 %v99_v5  ;;  %76 = vperm.xlu0 %407, %v55_v2   ;;  %v189_v21 = vld [vmem:[#allocation5 + $0x48] sm:$0xff]  ;;  %v188_v23 = vld [vmem:[#allocation5 + $0x40] sm:$0xff]  ;;  %v187_v25 = vld [vmem:[#allocation5 + $0x38] sm:$0xff] }
  0x24   :  { %333 = vmatprep.subr.mxu0 %v479_v1  ;;  %364 = vmatprep.subr.mxu1 %v479_v1  ;;  %v88_v26 = vld [vmem:[#allocation2 + $0x10] sm:$0xff]  ;;  %v87_v28 = vld [vmem:[#allocation2 + $0x8] sm:$0xff]  ;;  %v86_v30 = vld [vmem:[#allocation2] sm:$0xff]  ;;  %p456_p0 = pnand %p455_p13, %p449_p10 }
  0x25   :  { %334 = vmatpush3.msra.mxu0 %v98_v6  ;;  %365 = vmatpush3.msra.mxu1 %v194_v11  ;;  %v186_v27 = vld [vmem:[#allocation5 + $0x30] sm:$0xff]  ;;  %v185_v29 = vld [vmem:[#allocation5 + $0x28] sm:$0xff]  ;;  %v184_v31 = vld [vmem:[#allocation5 + $0x20] sm:$0xff] }
  0x26   :  { %335 = vmatprep.subr.mxu0 %v479_v1  ;;  %366 = vmatprep.subr.mxu1 %v479_v1  ;;  %v183_v32 = vld [vmem:[#allocation5 + $0x18] sm:$0xff]  ;;  %v56_v36 = vld [vmem:[%s582_s1] sm:$0x3]  ;;  %v182_v48 = vld [vmem:[#allocation5 + $0x10] sm:$0xff] }
  0x27   :  { %336 = vmatpush3.msra.mxu0 %v97_v8  ;;  %367 = vmatpush3.msra.mxu1 %v193_v13  ;;  %v66_v37 = vrot.slane %v56_v36, %v65_v35  ;;  %v82_v41 = vrot.slane %v56_v36, %v81_v38  ;;  %v290_v42 = vld [vmem:[%s583_s2] ss:$0 sm:$0xff]  ;;  %v181_v49 = vld [vmem:[#allocation5 + $0x8] sm:$0xff] }
  0x28   :  { %337 = vmatprep.subr.mxu0 %v479_v1  ;;  %368 = vmatprep.subr.mxu1 %v479_v1  ;;  %v180_v50 = vld [vmem:[#allocation5] sm:$0xff] }
  0x29   :  { %338 = vmatpush3.msra.mxu0 %v96_v9  ;;  %369 = vmatpush3.msra.mxu1 %v192_v15  ;;  %v291_v51 = vld [vmem:[%s585_s4] ss:$0 sm:$0xff] }
  0x2a   :  { %339 = vmatprep.subr.mxu0 %v479_v1  ;;  %370 = vmatprep.subr.mxu1 %v479_v1  ;;  %v292_v56 = vld [vmem:[%s587_s6] ss:$0 sm:$0xff] }
  0x2b   :  { %340 = vmatpush3.msra.mxu0 %v95_v12  ;;  %371 = vmatpush3.msra.mxu1 %v191_v17 }
  0x2c   :  { %341 = vmatprep.subr.mxu0 %v479_v1  ;;  %372 = vmatprep.subr.mxu1 %v479_v1 }
  0x2d   :  { %342 = vmatpush3.msra.mxu0 %v94_v14  ;;  %373 = vmatpush3.msra.mxu1 %v190_v19 }
  0x2e   :  { %343 = vmatprep.subr.mxu0 %v479_v1  ;;  %374 = vmatprep.subr.mxu1 %v479_v1 }
  0x2f   :  { %344 = vmatpush3.msra.mxu0 %v93_v16  ;;  %375 = vmatpush3.msra.mxu1 %v189_v21 }
  0x30   :  { %345 = vmatprep.subr.mxu0 %v479_v1  ;;  %376 = vmatprep.subr.mxu1 %v479_v1 }
  0x31   :  { %346 = vmatpush3.msra.mxu0 %v92_v18  ;;  %377 = vmatpush3.msra.mxu1 %v188_v23 }
  0x32   :  { %347 = vmatprep.subr.mxu0 %v479_v1  ;;  %378 = vmatprep.subr.mxu1 %v479_v1 }
  0x33   :  { %348 = vmatpush3.msra.mxu0 %v91_v20  ;;  %379 = vmatpush3.msra.mxu1 %v187_v25 }
  0x34   :  { %349 = vmatprep.subr.mxu0 %v479_v1  ;;  %380 = vmatprep.subr.mxu1 %v479_v1 }
  0x35   :  { %350 = vmatpush3.msra.mxu0 %v90_v22  ;;  %381 = vmatpush3.msra.mxu1 %v186_v27 }
  0x36   :  { %351 = vmatprep.subr.mxu0 %v479_v1  ;;  %382 = vmatprep.subr.mxu1 %v479_v1 }
  0x37   :  { %352 = vmatpush3.msra.mxu0 %v89_v24  ;;  %383 = vmatpush3.msra.mxu1 %v185_v29 }
  0x38   :  { %353 = vmatprep.subr.mxu0 %v479_v1  ;;  %384 = vmatprep.subr.mxu1 %v479_v1 }
  0x39   :  { %354 = vmatpush3.msra.mxu0 %v88_v26  ;;  %385 = vmatpush3.msra.mxu1 %v184_v31 }
  0x3a   :  { %355 = vmatprep.subr.mxu0 %v479_v1  ;;  %386 = vmatprep.subr.mxu1 %v479_v1 }
  0x3b   :  { %356 = vmatpush3.msra.mxu0 %v87_v28  ;;  %387 = vmatpush3.msra.mxu1 %v183_v32 }
  0x3c   :  { %357 = vmatprep.subr.mxu0 %v479_v1  ;;  %388 = vmatprep.subr.mxu1 %v479_v1 }
  0x3d   :  { %358 = vmatpush3.msra.mxu0 %v86_v30  ;;  %389 = vmatpush3.msra.mxu1 %v182_v48 }
  0x3e   :  { %390 = vmatprep.subr.mxu1 %v479_v1 }
  0x3f   :  { %391 = vmatpush3.msra.mxu1 %v181_v49 }
  0x40   :  { %392 = vmatprep.subr.mxu1 %v479_v1 }
  0x41   :  { %393 = vmatpush3.msra.mxu1 %v180_v50 }
  0x99   :  { %v61_v39 = vpop.permute.xlu0 %60 }
  0x9a   :  { %v67_v40 = vmul.f32 %v66_v37, %v61_v39 }
  0x9c   :  { %v74_v44 = vadd.f32 %v290_v42, %v67_v40 }
  0x9e   :  { %v77_v43 = vpop.permute.xlu0 %76 }
  0x9f   :  { %v83_v45 = vmul.f32 %v82_v41, %v77_v43 }
  0xa1   :  { %v84_v46 = vadd.f32 %v83_v45, %v74_v44 }
  0xa3   :  { %v85_v47 = vmax.f32 %v84_v46, 0.0 }
  0xa5   :  { %360 = vmatmul.mubr.f32.vlgmr.msra.gmra.mxu0 %v85_v47 }
 0x165   :  { %v175_v52 = vpop.f32.mrf.mxu0 }
 0x166   :  { %v176_v53 = vadd.f32 %v291_v51, %v175_v52 }
 0x167   :  { %v361_v54 = vpop.f32.mrf.mxu0 }
 0x168   :  { %v179_v55 = vmax.f32 %v176_v53, 0.0 }
 0x16a   :  { %395 = vmatmul.mubr.f32.vlgmr.msra.gmra.mxu1 %v179_v55 }
 0x22a   :  { %v269_v57 = vpop.f32.mrf.mxu1 }
 0x22b   :  { %v270_v58 = vadd.f32 %v292_v56, %v269_v57 }
 0x22c   :  { %v396_v59 = vpop.f32.mrf.mxu1 }
 0x22d   :  { %273 = vst [vmem:[#allocation7] sm:$0xff] %v270_v58 }
 0x22e   :  { %459 = shalt.err (!%p456_p0)
}
 0x22f   :  { %283 = dma.vmem_to_hbm [thread:$0]  %s281_s19, 128, %s588_s7, [#allocation4]  }
 0x230   :  { %472 = dma.done.wait [#allocation4], 128  }
 0x231   :  { %473 = vsyncadd [#allocation4], 4294967168 }
 0x232   :  { %287 = vsyncpa [#allocation3], 1 }
 0x233   :  { %288 = vsyncpa [#allocation6], 1 }
 0x234   :  { %289 = vsyncpa [#allocation4], 1 }

</bundles_post_ra>
